<compile_context>
chip_gen: v7x
topology: tpu7x:2x2x1
jax: 0.10.0
libtpu: 0.0.40
codegen_flags: <defaults>
</compile_context>

<pallas_src>
import jax
import jax.numpy as jnp
from jax.experimental import pallas as pl
from jax.experimental.pallas import tpu as pltpu

EPS = 1e-5


def _bn_kernel(x_ref, gamma_ref, beta_ref, o_ref):
    # x_ref: (C, M) f32 with M = N*H*W ; gamma/beta: (C, 1) f32 ; o_ref: (C, M).
    _, m = x_ref.shape
    inv_m = 1.0 / float(m)

    # Stats pass: one lane-axis (XLU) reduce per moment.
    x = x_ref[...]
    s1 = jnp.sum(x, axis=1, keepdims=True)        # (C, 1)
    s2 = jnp.sum(x * x, axis=1, keepdims=True)    # (C, 1)

    mean = s1 * inv_m
    # Biased variance (PyTorch normalization path); clamp guards E[x^2]-mean^2 cancellation.
    var = jnp.maximum(s2 * inv_m - mean * mean, 0.0)
    inv_std = jax.lax.rsqrt(var + EPS)            # EUP

    scale = gamma_ref[...] * inv_std              # (C, 1)
    shift = beta_ref[...] - mean * scale          # (C, 1)

    # Normalize pass: re-read from VMEM (cheap vld), single fused multiply-add per element.
    o_ref[...] = (x_ref[...] * scale + shift).astype(o_ref.dtype)


def batchnorm2d_pallas(x_nchw, gamma, beta):
    """x_nchw: (N, C, H, W) NCHW float32. Returns (N, C, H, W). Training-mode batch statistics."""
    N, C, H, W = x_nchw.shape
    M = N * H * W

    # Present channels on the sublane axis, spatial (+batch) on the lane axis.
    if N == 1:
        x2 = x_nchw.reshape(C, M)                       # zero-copy reshape of contiguous NCHW
    else:
        x2 = jnp.moveaxis(x_nchw, 1, 0).reshape(C, M)   # (C, N*H*W)

    gamma2 = gamma.reshape(C, 1).astype(jnp.float32)
    beta2 = beta.reshape(C, 1).astype(jnp.float32)

    out2 = pl.pallas_call(
        _bn_kernel,
        out_shape=jax.ShapeDtypeStruct((C, M), x2.dtype),
        grid=(1,),
        in_specs=[
            pl.BlockSpec((C, M), lambda i: (0, 0)),
            pl.BlockSpec((C, 1), lambda i: (0, 0)),
            pl.BlockSpec((C, 1), lambda i: (0, 0)),
        ],
        out_specs=pl.BlockSpec((C, M), lambda i: (0, 0)),
        compiler_params=pltpu.CompilerParams(
            dimension_semantics=("arbitrary",),
        ),
    )(x2, gamma2, beta2)

    if N == 1:
        return out2.reshape(N, C, H, W)
    return jnp.moveaxis(out2.reshape(C, N, H, W), 0, 1)


if __name__ == "__main__":
    key = jax.random.PRNGKey(0)
    # Shape implied by the module's forward: x403 = randn([1, 128, 14, 14])
    N, C, H, W = 1, 128, 14, 14
    x = jax.random.normal(key, (N, C, H, W), dtype=jnp.float32)

    # BatchNorm2d default-initialized affine parameters (weight=1, bias=0).
    gamma = jnp.ones((C,), dtype=jnp.float32)
    beta = jnp.zeros((C,), dtype=jnp.float32)

    out = batchnorm2d_pallas(x, gamma, beta)
    jax.block_until_ready(out)

    # Reference check (pure JAX, training-mode batchnorm semantics).
    mean = jnp.mean(x, axis=(0, 2, 3), keepdims=True)
    var = jnp.mean((x - mean) ** 2, axis=(0, 2, 3), keepdims=True)
    ref = (x - mean) / jnp.sqrt(var + EPS) * gamma.reshape(1, C, 1, 1) + beta.reshape(1, C, 1, 1)
    assert out.shape == x.shape
    assert jnp.allclose(out, ref, atol=1e-4, rtol=1e-4), "mismatch vs reference"

    # TODO(synk): running_mean / running_var buffer updates (unbiased variance, momentum=0.1)
    # are a module side effect, not part of the returned forward output, and are not produced here.

    print("KERNEL_OK")
</pallas_src>

<mosaic_0001>
module attributes {stable_mosaic.version = 11 : i64} {
  func.func @_bn_kernel(%arg0: i32, %arg1: memref<128x196xf32, #tpu.memory_space<vmem>>, %arg2: memref<128x1xf32, #tpu.memory_space<vmem>>, %arg3: memref<128x1xf32, #tpu.memory_space<vmem>>, %arg4: memref<128x196xf32, #tpu.memory_space<vmem>>) attributes {dimension_semantics = [#tpu.dimension_semantics<arbitrary>], iteration_bounds = array<i64: 1>, scalar_prefetch = 0 : i64, scratch_operands = 0 : i64, tpu.core_type = #tpu.core_type<tc>, window_params = [{pipeline_mode = #tpu.pipeline_mode<synchronous>, transform_indices = @transform_0, window_bounds = array<i64: 128, 196>}, {pipeline_mode = #tpu.pipeline_mode<synchronous>, transform_indices = @transform_1, window_bounds = array<i64: 128, 1>}, {pipeline_mode = #tpu.pipeline_mode<synchronous>, transform_indices = @transform_2, window_bounds = array<i64: 128, 1>}, {pipeline_mode = #tpu.pipeline_mode<synchronous>, transform_indices = @transform_3, window_bounds = array<i64: 128, 196>}]} {
    %c0 = arith.constant 0 : index
    %c0_0 = arith.constant 0 : index
    %0 = vector.load %arg1[%c0, %c0_0] : memref<128x196xf32, #tpu.memory_space<vmem>>, vector<128x196xf32>
    %cst = arith.constant dense<0.000000e+00> : vector<128xf32>
    %1 = vector.multi_reduction <add>, %0, %cst [1] : vector<128x196xf32> to vector<128xf32>
    %2 = vector.shape_cast %1 : vector<128xf32> to vector<128x1xf32>
    %3 = arith.mulf %0, %0 : vector<128x196xf32>
    %cst_1 = arith.constant dense<0.000000e+00> : vector<128xf32>
    %4 = vector.multi_reduction <add>, %3, %cst_1 [1] : vector<128x196xf32> to vector<128xf32>
    %5 = vector.shape_cast %4 : vector<128xf32> to vector<128x1xf32>
    %cst_2 = arith.constant 0.00510204071 : f32
    %6 = vector.broadcast %cst_2 : f32 to vector<128x1xf32>
    %7 = arith.mulf %2, %6 : vector<128x1xf32>
    %cst_3 = arith.constant 0.00510204071 : f32
    %8 = vector.broadcast %cst_3 : f32 to vector<128x1xf32>
    %9 = arith.mulf %5, %8 : vector<128x1xf32>
    %10 = arith.mulf %7, %7 : vector<128x1xf32>
    %11 = arith.subf %9, %10 : vector<128x1xf32>
    %cst_4 = arith.constant 0.000000e+00 : f32
    %12 = vector.broadcast %cst_4 : f32 to vector<128x1xf32>
    %13 = arith.maximumf %11, %12 : vector<128x1xf32>
    %cst_5 = arith.constant 9.99999974E-6 : f32
    %14 = vector.broadcast %cst_5 : f32 to vector<128x1xf32>
    %15 = arith.addf %13, %14 : vector<128x1xf32>
    %16 = math.rsqrt %15 : vector<128x1xf32>
    %c0_6 = arith.constant 0 : index
    %c0_7 = arith.constant 0 : index
    %17 = vector.load %arg2[%c0_6, %c0_7] : memref<128x1xf32, #tpu.memory_space<vmem>>, vector<128x1xf32>
    %18 = arith.mulf %17, %16 : vector<128x1xf32>
    %c0_8 = arith.constant 0 : index
    %c0_9 = arith.constant 0 : index
    %19 = vector.load %arg3[%c0_8, %c0_9] : memref<128x1xf32, #tpu.memory_space<vmem>>, vector<128x1xf32>
    %20 = arith.mulf %7, %18 : vector<128x1xf32>
    %21 = arith.subf %19, %20 : vector<128x1xf32>
    %c0_10 = arith.constant 0 : index
    %c0_11 = arith.constant 0 : index
    %22 = vector.load %arg1[%c0_10, %c0_11] : memref<128x196xf32, #tpu.memory_space<vmem>>, vector<128x196xf32>
    %23 = vector.broadcast %18 : vector<128x1xf32> to vector<128x196xf32>
    %24 = arith.mulf %22, %23 : vector<128x196xf32>
    %25 = vector.broadcast %21 : vector<128x1xf32> to vector<128x196xf32>
    %26 = arith.addf %24, %25 : vector<128x196xf32>
    %c0_12 = arith.constant 0 : index
    %c0_13 = arith.constant 0 : index
    %27 = vector.load %arg4[%c0_12, %c0_13] : memref<128x196xf32, #tpu.memory_space<vmem>>, vector<128x196xf32>
    tpu.vector_store %arg4[%c0_12, %c0_13], %26 {strides = array<i32>} : memref<128x196xf32, #tpu.memory_space<vmem>>, vector<128x196xf32>,
    return
  }
  func.func @transform_0(%arg0: i32) -> (i32, i32) {
    %c0_i32 = arith.constant 0 : i32
    %c0_i32_0 = arith.constant 0 : i32
    %c0_i32_1 = arith.constant 0 : i32
    return %c0_i32, %c0_i32_0 : i32, i32
  }
  func.func @transform_1(%arg0: i32) -> (i32, i32) {
    %c0_i32 = arith.constant 0 : i32
    %c0_i32_0 = arith.constant 0 : i32
    %c0_i32_1 = arith.constant 0 : i32
    return %c0_i32, %c0_i32_0 : i32, i32
  }
  func.func @transform_2(%arg0: i32) -> (i32, i32) {
    %c0_i32 = arith.constant 0 : i32
    %c0_i32_0 = arith.constant 0 : i32
    %c0_i32_1 = arith.constant 0 : i32
    return %c0_i32, %c0_i32_0 : i32, i32
  }
  func.func @transform_3(%arg0: i32) -> (i32, i32) {
    %c0_i32 = arith.constant 0 : i32
    %c0_i32_0 = arith.constant 0 : i32
    %c0_i32_1 = arith.constant 0 : i32
    return %c0_i32, %c0_i32_0 : i32, i32
  }
}

</mosaic_0001>

<bundles_post_ra>
// kernel: tpu_custom_call.1
= control target key start
LH: loop header
LB: loop body
LE: loop exit
PB: predicated region body
PF: predicated region fallthrough
CT: control target
= control target key end

     0   :  { %vm46_vm0 = vcmask 556032   ;;  %s1401_s0 = inlined_call_operand.vmem [shape: f32[128,196], index: 0, kind: input, shape index: {}]   ;;  %s1402_s1 = inlined_call_operand.vmem [shape: f32[128,1], index: 1, kind: input, shape index: {}]   ;;  %s1403_s2 = inlined_call_operand.vmem [shape: f32[128,1], index: 2, kind: input, shape index: {}]   ;;  %s1404_s3 = inlined_call_operand.vmem [shape: f32[128,196], index: 3, kind: output, shape index: {}]  }
   0x1   :  { %v718_v0 = vld [vmem:[%s1401_s0 + $0x20] sm:$0xff]  ;;  %v723_v1 = vld [vmem:[%s1401_s0 + $0x28] sm:$0xff]  ;;  %v740_v5 = vld [vmem:[%s1401_s0 + $0x30] sm:$0xff] }
   0x2   :  { %v728_v2 = vld [vmem:[%s1401_s0] sm:$0xff]  ;;  %v55_v3 = vsel %vm46_vm0, %v723_v1, 0.0  ;;  %v735_v4 = vld [vmem:[%s1401_s0 + $0x8] sm:$0xff]  ;;  %v745_v6 = vld [vmem:[%s1401_s0 + $0x38] sm:$0xff] }
   0x3   :  { %v56_v7 = vadd.f32 %v55_v3, %v718_v0  ;;  %v47_v8 = vsel %vm46_vm0, %v735_v4, 0.0  ;;  %v59_v9 = vsel %vm46_vm0, %v745_v6, 0.0  ;;  %v755_v10 = vld [vmem:[%s1401_s0 + $0x10] sm:$0xff]  ;;  %v760_v11 = vld [vmem:[%s1401_s0 + $0x18] sm:$0xff]  ;;  %v773_v15 = vld [vmem:[%s1401_s0 + $0x48] sm:$0xff]  ;;  %v112_v63 = vmul.f32 %v735_v4, %v735_v4 }
   0x4   :  { %v48_v12 = vadd.f32 %v47_v8, %v728_v2  ;;  %v51_v13 = vsel %vm46_vm0, %v760_v11, 0.0  ;;  %v768_v14 = vld [vmem:[%s1401_s0 + $0x58] sm:$0xff]  ;;  %v60_v16 = vadd.f32 %v59_v9, %v740_v5  ;;  %v780_v18 = vld [vmem:[%s1401_s0 + $0x50] sm:$0xff]  ;;  %v787_v20 = vld [vmem:[%s1401_s0 + $0x40] sm:$0xff]  ;;  %v63_v21 = vsel %vm46_vm0, %v773_v15, 0.0 }
   0x5   :  { %57 = vadd.xlane.f32.xlu1 %v56_v7  ;;  %v52_v17 = vadd.f32 %v51_v13, %v755_v10  ;;  %v67_v19 = vsel %vm46_vm0, %v768_v14, 0.0  ;;  %v794_v22 = vld [vmem:[%s1401_s0 + $0x78] sm:$0xff]  ;;  %v799_v23 = vld [vmem:[%s1401_s0 + $0x68] sm:$0xff]  ;;  %v64_v25 = vadd.f32 %v63_v21, %v787_v20  ;;  %v806_v26 = vld [vmem:[%s1401_s0 + $0x70] sm:$0xff]  ;;  %v114_v60 = vmul.f32 %v760_v11, %v760_v11 }
   0x6   :  { %49 = vadd.xlane.f32.xlu0 %v48_v12  ;;  %1417 = vst [vmem:[#allocation2_spill] sm:$0xff] %v799_v23  ;;  %v68_v24 = vadd.f32 %v67_v19, %v780_v18  ;;  %v75_v27 = vsel %vm46_vm0, %v794_v22, 0.0  ;;  %v813_v28 = vld [vmem:[%s1401_s0 + $0x60] sm:$0xff]  ;;  %v71_v29 = vsel %vm46_vm0, %v799_v23, 0.0  ;;  %v820_v30 = vld [vmem:[%s1401_s0 + $0x98] sm:$0xff]  ;;  %v825_v31 = vld [vmem:[%s1401_s0 + $0x88] sm:$0xff]  ;;  %v113_v7 = vmul.f32 %v755_v10, %v755_v10 }
   0x7   :  { %1418 = vst [vmem:[#allocation3_spill] sm:$0xff] %v813_v28  ;;  %1419 = vst [vmem:[#allocation4_spill] sm:$0xff] %v825_v31  ;;  %v76_v32 = vadd.f32 %v75_v27, %v806_v26  ;;  %v72_v33 = vadd.f32 %v71_v29, %v813_v28  ;;  %v832_v34 = vld [vmem:[%s1401_s0 + $0x90] sm:$0xff]  ;;  %v83_v35 = vsel %vm46_vm0, %v820_v30, 0.0  ;;  %v839_v36 = vld [vmem:[%s1401_s0 + $0x80] sm:$0xff]  ;;  %v79_v37 = vsel %vm46_vm0, %v825_v31, 0.0 }
   0x8   :  { %1420 = vst [vmem:[#allocation5_spill] sm:$0xff] %v839_v36  ;;  %v846_v38 = vld [vmem:[%s1401_s0 + $0xb8] sm:$0xff]  ;;  %v851_v39 = vld [vmem:[%s1401_s0 + $0xa8] sm:$0xff]  ;;  %v84_v40 = vadd.f32 %v83_v35, %v832_v34  ;;  %v80_v41 = vadd.f32 %v79_v37, %v839_v36  ;;  %v858_v42 = vld [vmem:[%s1401_s0 + $0xb0] sm:$0xff]  ;;  %v147_v9 = vsel %vm46_vm0, %v114_v60, 0.0  ;;  %v111_v12 = vmul.f32 %v728_v2, %v728_v2 }
   0x9   :  { %61 = vadd.xlane.f32.xlu1 %v60_v16  ;;  %1421 = vst [vmem:[#allocation6_spill] sm:$0xff] %v851_v39  ;;  %v91_v43 = vsel %vm46_vm0, %v846_v38, 0.0  ;;  %v865_v44 = vld [vmem:[%s1401_s0 + $0xa0] sm:$0xff]  ;;  %v87_v45 = vsel %vm46_vm0, %v851_v39, 0.0  ;;  %v872_v46 = vld [vmem:[%s1401_s0 + $0xd8] sm:$0xff]  ;;  %v877_v47 = vld [vmem:[%s1401_s0 + $0xc8] sm:$0xff]  ;;  %v118_v13 = vmul.f32 %v745_v6, %v745_v6  ;;  %v148_v19 = vadd.f32 %v147_v9, %v113_v7 }
   0xa   :  { %53 = vadd.xlane.f32.xlu0 %v52_v17  ;;  %1422 = vst [vmem:[#allocation7_spill] sm:$0xff] %v865_v44  ;;  %1423 = vst [vmem:[#allocation8_spill] sm:$0xff] %v877_v47  ;;  %v92_v48 = vadd.f32 %v91_v43, %v858_v42  ;;  %v88_v49 = vadd.f32 %v87_v45, %v865_v44  ;;  %v884_v50 = vld [vmem:[%s1401_s0 + $0xd0] sm:$0xff]  ;;  %v99_v51 = vsel %vm46_vm0, %v872_v46, 0.0  ;;  %v891_v52 = vld [vmem:[%s1401_s0 + $0xc0] sm:$0xff]  ;;  %v95_v53 = vsel %vm46_vm0, %v877_v47, 0.0 }
   0xb   :  { %1424 = vst [vmem:[#allocation9_spill] sm:$0xff] %v891_v52  ;;  %v898_v54 = vld [vmem:[%s1401_s0 + $0xf8] sm:$0xff]  ;;  %v903_v55 = vld [vmem:[%s1401_s0 + $0xe8] sm:$0xff]  ;;  %v100_v56 = vadd.f32 %v99_v51, %v884_v50  ;;  %v96_v57 = vadd.f32 %v95_v53, %v891_v52  ;;  %v910_v58 = vld [vmem:[%s1401_s0 + $0xf0] sm:$0xff]  ;;  %v143_v16 = vsel %vm46_vm0, %v112_v63, 0.0  ;;  %v116_v17 = vmul.f32 %v723_v1, %v723_v1 }
   0xc   :  { %1425 = vst [vmem:[#allocation10_spill] sm:$0xff] %v898_v54  ;;  %1426 = vst [vmem:[#allocation11_spill] sm:$0xff] %v903_v55  ;;  %v107_v59 = vsel %vm46_vm0, %v898_v54, 0.0  ;;  %v919_v61 = vld [vmem:[%s1401_s0 + $0xe0] sm:$0xff]  ;;  %v103_v62 = vsel %vm46_vm0, %v903_v55, 0.0  ;;  %v117_v21 = vmul.f32 %v740_v5, %v740_v5  ;;  %v115_v27 = vmul.f32 %v718_v0, %v718_v0 }
   0xd   :  { %69 = vadd.xlane.f32.xlu1 %v68_v24  ;;  %1427 = vst [vmem:[#allocation12_spill] sm:$0xff] %v910_v58  ;;  %1428 = vst [vmem:[#allocation13_spill] sm:$0xff] %v919_v61  ;;  %v108_v3 = vadd.f32 %v107_v59, %v910_v58  ;;  %v104_v8 = vadd.f32 %v103_v62, %v919_v61  ;;  %v144_v24 = vadd.f32 %v143_v16, %v111_v12 }
   0xe   :  { %65 = vadd.xlane.f32.xlu0 %v64_v25  ;;  %v155_v25 = vsel %vm46_vm0, %v118_v13, 0.0  ;;  %v122_v29 = vmul.f32 %v768_v14, %v768_v14  ;;  %v121_v37 = vmul.f32 %v780_v18, %v780_v18  ;;  %v119_v43 = vmul.f32 %v787_v20, %v787_v20 }
   0xf   :  { %v156_v35 = vadd.f32 %v155_v25, %v117_v21  ;;  %v126_v45 = vmul.f32 %v794_v22, %v794_v22  ;;  %v125_v53 = vmul.f32 %v806_v26, %v806_v26  ;;  %v123_v59 = vmul.f32 %v813_v28, %v813_v28 }
  0x10   :  { %v130_v60 = vmul.f32 %v820_v30, %v820_v30  ;;  %v128_v63 = vmul.f32 %v825_v31, %v825_v31  ;;  %v129_v7 = vmul.f32 %v832_v34, %v832_v34  ;;  %v127_v12 = vmul.f32 %v839_v36, %v839_v36 }
  0x11   :  { %77 = vadd.xlane.f32.xlu1 %v76_v32  ;;  %v151_v32 = vsel %vm46_vm0, %v116_v17, 0.0  ;;  %v134_v13 = vmul.f32 %v846_v38, %v846_v38  ;;  %v132_v17 = vmul.f32 %v851_v39, %v851_v39  ;;  %v133_v21 = vmul.f32 %v858_v42, %v858_v42 }
  0x12   :  { %73 = vadd.xlane.f32.xlu0 %v72_v33  ;;  %v120_v33 = vmul.f32 %v773_v15, %v773_v15  ;;  %v179_v9 = vsel %vm46_vm0, %v130_v60, 0.0  ;;  %v175_v16 = vsel %vm46_vm0, %v128_v63, 0.0 }
  0x13   :  { %v187_v25 = vsel %vm46_vm0, %v134_v13, 0.0 }
  0x15   :  { %85 = vadd.xlane.f32.xlu1 %v84_v40  ;;  %v152_v40 = vadd.f32 %v151_v32, %v115_v27  ;;  %v131_v27 = vmul.f32 %v865_v44, %v865_v44  ;;  %v183_v32 = vsel %vm46_vm0, %v132_v17, 0.0 }
  0x16   :  { %81 = vadd.xlane.f32.xlu0 %v80_v41  ;;  %v163_v41 = vsel %vm46_vm0, %v122_v29, 0.0  ;;  %v138_v29 = vmul.f32 %v872_v46, %v872_v46 }
  0x17   :  { %v164_v51 = vadd.f32 %v163_v41, %v121_v37  ;;  %v137_v37 = vmul.f32 %v884_v50, %v884_v50 }
  0x18   :  { %v195_v41 = vsel %vm46_vm0, %v138_v29, 0.0 }
  0x19   :  { %93 = vadd.xlane.f32.xlu1 %v92_v48  ;;  %v159_v48 = vsel %vm46_vm0, %v120_v33, 0.0  ;;  %v136_v33 = vmul.f32 %v877_v47, %v877_v47 }
  0x1a   :  { %89 = vadd.xlane.f32.xlu0 %v88_v49  ;;  %v124_v49 = vmul.f32 %v799_v23, %v799_v23 }
  0x1c   :  { %v167_v62 = vsel %vm46_vm0, %v124_v49, 0.0  ;;  %v140_v49 = vmul.f32 %v903_v55, %v903_v55 }
  0x1d   :  { %101 = vadd.xlane.f32.xlu1 %v100_v56  ;;  %v160_v56 = vadd.f32 %v159_v48, %v119_v43  ;;  %v135_v43 = vmul.f32 %v891_v52, %v891_v52  ;;  %v191_v48 = vsel %vm46_vm0, %v136_v33, 0.0 }
  0x1e   :  { %97 = vadd.xlane.f32.xlu0 %v96_v57  ;;  %v171_v57 = vsel %vm46_vm0, %v126_v45, 0.0  ;;  %v142_v45 = vmul.f32 %v898_v54, %v898_v54  ;;  %v199_v60 = vsel %vm46_vm0, %v140_v49, 0.0 }
  0x21   :  { %109 = vadd.xlane.f32.xlu1 %v108_v3  ;;  %v172_v3 = vadd.f32 %v171_v57, %v125_v53  ;;  %v141_v53 = vmul.f32 %v910_v58, %v910_v58  ;;  %v203_v57 = vsel %vm46_vm0, %v142_v45, 0.0 }
  0x22   :  { %105 = vadd.xlane.f32.xlu0 %v104_v8  ;;  %v168_v8 = vadd.f32 %v167_v62, %v123_v59  ;;  %v139_v59 = vmul.f32 %v919_v61, %v919_v61 }
  0x23   :  { %v204_v62 = vadd.f32 %v203_v57, %v141_v53 }
  0x24   :  { %v200_v63 = vadd.f32 %v199_v60, %v139_v59 }
  0x25   :  { %149 = vadd.xlane.f32.xlu1 %v148_v19  ;;  %v180_v19 = vadd.f32 %v179_v9, %v129_v7 }
  0x26   :  { %145 = vadd.xlane.f32.xlu0 %v144_v24  ;;  %v176_v24 = vadd.f32 %v175_v16, %v127_v12 }
  0x29   :  { %157 = vadd.xlane.f32.xlu1 %v156_v35  ;;  %v188_v35 = vadd.f32 %v187_v25, %v133_v21 }
  0x2a   :  { %153 = vadd.xlane.f32.xlu0 %v152_v40  ;;  %v184_v40 = vadd.f32 %v183_v32, %v131_v27 }
  0x2d   :  { %165 = vadd.xlane.f32.xlu1 %v164_v51  ;;  %v196_v51 = vadd.f32 %v195_v41, %v137_v37 }
  0x2e   :  { %161 = vadd.xlane.f32.xlu0 %v160_v56  ;;  %v192_v56 = vadd.f32 %v191_v48, %v135_v43 }
  0x31   :  { %173 = vadd.xlane.f32.xlu1 %v172_v3  ;;  %v694_v3 = vmov 0  }
  0x32   :  { %169 = vadd.xlane.f32.xlu0 %v168_v8  ;;  %661 = vset.pattern.permute.xlu1 %v694_v3 }
  0x33   :  { %660 = vset.pattern.permute.xlu0 %v694_v3 }
  0x35   :  { %181 = vadd.xlane.f32.xlu1 %v180_v19 }
  0x36   :  { %177 = vadd.xlane.f32.xlu0 %v176_v24 }
  0x39   :  { %189 = vadd.xlane.f32.xlu1 %v188_v35 }
  0x3a   :  { %185 = vadd.xlane.f32.xlu0 %v184_v40 }
  0x3d   :  { %197 = vadd.xlane.f32.xlu1 %v196_v51 }
  0x3e   :  { %193 = vadd.xlane.f32.xlu0 %v192_v56 }
  0x41   :  { %205 = vadd.xlane.f32.xlu1 %v204_v62 }
  0x42   :  { %201 = vadd.xlane.f32.xlu0 %v200_v63 }
  0x92   :  { %v58_v7 = vpop.xlane.xlu1 %57 }
  0x93   :  { %v50_v8 = vpop.xlane.xlu0 %49  ;;  %v1023_v51 = vmul.f32 0.0051020407, %v58_v7 }
  0x94   :  { %v1017_v40 = vmul.f32 0.0051020407, %v50_v8 }
  0x95   :  { %v241_v7 = vmul.f32 %v1023_v51, %v1023_v51 }
  0x96   :  { %v62_v9 = vpop.xlane.xlu1 %61  ;;  %v239_v53 = vmul.f32 %v1017_v40, %v1017_v40 }
  0x97   :  { %v54_v12 = vpop.xlane.xlu0 %53  ;;  %v1019_v43 = vmul.f32 0.0051020407, %v62_v9 }
  0x98   :  { %v1013_v35 = vmul.f32 0.0051020407, %v54_v12 }
  0x99   :  { %v242_v63 = vmul.f32 %v1019_v43, %v1019_v43 }
  0x9a   :  { %v70_v13 = vpop.xlane.xlu1 %69  ;;  %v240_v45 = vmul.f32 %v1013_v35, %v1013_v35 }
  0x9b   :  { %v66_v16 = vpop.xlane.xlu0 %65  ;;  %v1027_v59 = vmul.f32 0.0051020407, %v70_v13 }
  0x9c   :  { %v1031_v3 = vmul.f32 0.0051020407, %v66_v16 }
  0x9d   :  { %v244_v13 = vmul.f32 %v1027_v59, %v1027_v59 }
  0x9e   :  { %v78_v17 = vpop.xlane.xlu1 %77  ;;  %v243_v16 = vmul.f32 %v1031_v3, %v1031_v3 }
  0x9f   :  { %v74_v19 = vpop.xlane.xlu0 %73 }
  0xa0   :  { %v1039_v47 = vmul.f32 0.0051020407, %v74_v19 }
  0xa2   :  { %v86_v21 = vpop.xlane.xlu1 %85 }
  0xa3   :  { %v82_v24 = vpop.xlane.xlu0 %81 }
  0xa6   :  { %v1003_v25 = vpop.xlane.xlu1 %93 }
  0xa7   :  { %v1005_v27 = vpop.xlane.xlu0 %89 }
  0xa8   :  { %v1074_v58 = vmul.f32 0.0051020407, %v1005_v27 }
  0xaa   :  { %v1007_v29 = vpop.xlane.xlu1 %101 }
  0xab   :  { %v1009_v32 = vpop.xlane.xlu0 %97 }
  0xae   :  { %v1011_v33 = vpop.xlane.xlu1 %109 }
  0xaf   :  { %v1015_v37 = vpop.xlane.xlu0 %105 }
  0xb2   :  { %v150_v41 = vpop.xlane.xlu1 %149 }
  0xb3   :  { %v224_v48 = vmul.f32 0.0051020407, %v150_v41  ;;  %v146_v49 = vpop.xlane.xlu0 %145 }
  0xb4   :  { %v223_v56 = vmul.f32 0.0051020407, %v146_v49 }
  0xb5   :  { %v256_v57 = vsub.f32 %v224_v48, %v240_v45 }
  0xb6   :  { %v255_v60 = vsub.f32 %v223_v56, %v239_v53  ;;  %v158_v62 = vpop.xlane.xlu1 %157 }
  0xb7   :  { %v272_v8 = vmax.f32 %v256_v57, 0.0  ;;  %v226_v9 = vmul.f32 0.0051020407, %v158_v62  ;;  %v154_v12 = vpop.xlane.xlu0 %153 }
  0xb8   :  { %v271_v41 = vmax.f32 %v255_v60, 0.0  ;;  %v225_v55 = vmul.f32 0.0051020407, %v154_v12 }
  0xb9   :  { %v288_v61 = vadd.f32 1e-05, %v272_v8  ;;  %v258_v49 = vsub.f32 %v226_v9, %v242_v63 }
  0xba   :  { %v287_v45 = vadd.f32 1e-05, %v271_v41  ;;  %v257_v48 = vsub.f32 %v225_v55, %v241_v7  ;;  %v166_v53 = vpop.xlane.xlu1 %165  ;;  %v1041_v41 = vmul.f32 0.0051020407, %v78_v17  ;;  %v1043_v55 = vmul.f32 0.0051020407, %v86_v21 }
  0xbb   :  { %662 = vrsqrt.f32 %v288_v61  ;;  %v274_v56 = vmax.f32 %v258_v49, 0.0  ;;  %v228_v57 = vmul.f32 0.0051020407, %v166_v53  ;;  %v162_v62 = vpop.xlane.xlu0 %161  ;;  %v245_v61 = vmul.f32 %v1039_v47, %v1039_v47 }
  0xbc   :  { %664 = vrsqrt.f32 %v287_v45  ;;  %v273_v60 = vmax.f32 %v257_v48, 0.0  ;;  %v227_v12 = vmul.f32 0.0051020407, %v162_v62  ;;  %v1047_v53 = vmul.f32 0.0051020407, %v82_v24 }
  0xbd   :  { %v260_v8 = vsub.f32 %v228_v57, %v244_v13  ;;  %v290_v63 = vadd.f32 1e-05, %v274_v56  ;;  %v248_v17 = vmul.f32 %v1043_v55, %v1043_v55  ;;  %v1052_v21 = vmul.f32 0.0051020407, %v1003_v25 }
  0xbe   :  { %v289_v9 = vadd.f32 1e-05, %v273_v60  ;;  %v259_v52 = vsub.f32 %v227_v12, %v243_v16  ;;  %v174_v39 = vpop.xlane.xlu1 %173  ;;  %v246_v24 = vmul.f32 %v1041_v41, %v1041_v41  ;;  %v1060_v60 = vmul.f32 0.0051020407, %v1007_v29 }
  0xbf   :  { %v170_v7 = vpop.xlane.xlu0 %169  ;;  %v276_v45 = vmax.f32 %v260_v8, 0.0  ;;  %v230_v48 = vmul.f32 0.0051020407, %v174_v39  ;;  %v319_v39 = vld [vmem:[%s1402_s1] sm:$0xff]  ;;  %v247_v25 = vmul.f32 %v1047_v53, %v1047_v53  ;;  %v250_v29 = vmul.f32 %v1052_v21, %v1052_v21 }
  0xc0   :  { %666 = vrsqrt.f32 %v289_v9  ;;  %v275_v49 = vmax.f32 %v259_v52, 0.0  ;;  %v229_v19 = vmul.f32 0.0051020407, %v170_v7  ;;  %v320_v52 = vld [vmem:[%s1402_s1 + $0x8] sm:$0xff] }
  0xc1   :  { %668 = vrsqrt.f32 %v290_v63  ;;  %v292_v8 = vadd.f32 1e-05, %v276_v45  ;;  %v252_v45 = vmul.f32 %v1060_v60, %v1060_v60 }
  0xc2   :  { %v291_v13 = vadd.f32 1e-05, %v275_v49  ;;  %v261_v56 = vsub.f32 %v229_v19, %v245_v61  ;;  %v182_v16 = vpop.xlane.xlu1 %181  ;;  %v262_v61 = vsub.f32 %v230_v48, %v246_v24  ;;  %v1083_v48 = vmul.f32 0.0051020407, %v1011_v33  ;;  %v322_v33 = vld [vmem:[%s1402_s1 + $0x18] sm:$0xff] }
  0xc3   :  { %v232_v57 = vmul.f32 0.0051020407, %v182_v16  ;;  %v178_v62 = vpop.xlane.xlu0 %177 }
  0xc4   :  { %v231_v9 = vmul.f32 0.0051020407, %v178_v62  ;;  %670 = vrsqrt.f32 %v291_v13  ;;  %v277_v49 = vmax.f32 %v261_v56, 0.0  ;;  %v321_v13 = vld [vmem:[%s1402_s1 + $0x10] sm:$0xff]  ;;  %v278_v27 = vmax.f32 %v262_v61, 0.0 }
  0xc5   :  { %v663_v12 = vpop.eup %662  ;;  %v264_v63 = vsub.f32 %v232_v57, %v248_v17  ;;  %672 = vrsqrt.f32 %v292_v8 }
  0xc6   :  { %v665_v7 = vpop.eup %664  ;;  %v190_v19 = vpop.xlane.xlu1 %189  ;;  %v1067_v16 = vmul.f32 %v663_v12, %v320_v52  ;;  %v263_v17 = vsub.f32 %v231_v9, %v247_v25  ;;  %v293_v52 = vadd.f32 1e-05, %v277_v49  ;;  %v294_v61 = vadd.f32 1e-05, %v278_v27 }
  0xc7   :  { %v280_v44 = vmax.f32 %v264_v63, 0.0  ;;  %v234_v31 = vmul.f32 0.0051020407, %v190_v19  ;;  %v186_v36 = vpop.xlane.xlu0 %185  ;;  %v1071_v54 = vmul.f32 %v665_v7, %v319_v39 }
  0xc8   :  { %406 = vperm.xlu1 %661, %v1067_v16   ;;  %v233_v24 = vmul.f32 0.0051020407, %v186_v36  ;;  %v254_v36 = vmul.f32 %v1083_v48, %v1083_v48  ;;  %v279_v25 = vmax.f32 %v263_v17, 0.0  ;;  %v1104_v17 = vmul.f32 0.0051020407, %v1015_v37  ;;  %v328_v37 = vld [vmem:[%s1402_s1 + $0x48] sm:$0xff] }
  0xc9   :  { %v296_v56 = vadd.f32 1e-05, %v280_v44  ;;  %v266_v57 = vsub.f32 %v234_v31, %v250_v29  ;;  %401 = vperm.xlu0 %660, %v1071_v54   ;;  %v249_v44 = vmul.f32 %v1074_v58, %v1074_v58  ;;  %v1091_v31 = vmul.f32 0.0051020407, %v1009_v32 }
  0xca   :  { %v667_v62 = vpop.eup %666  ;;  %v198_v39 = vpop.xlane.xlu1 %197  ;;  %v295_v27 = vadd.f32 1e-05, %v279_v25  ;;  %v253_v25 = vmul.f32 %v1104_v17, %v1104_v17 }
  0xcb   :  { %674 = vrsqrt.f32 %v296_v56  ;;  %v282_v12 = vmax.f32 %v266_v57, 0.0  ;;  %v236_v63 = vmul.f32 0.0051020407, %v198_v39  ;;  %v194_v7 = vpop.xlane.xlu0 %193  ;;  %v1086_v19 = vmul.f32 %v667_v62, %v321_v13  ;;  %v669_v23 = vpop.eup %668 }
  0xcc   :  { %676 = vrsqrt.f32 %v293_v52  ;;  %v265_v49 = vsub.f32 %v233_v24, %v249_v44  ;;  %v235_v29 = vmul.f32 0.0051020407, %v194_v7  ;;  %v1099_v62 = vmul.f32 %v669_v23, %v322_v33 }
  0xcd   :  { %v298_v8 = vadd.f32 1e-05, %v282_v12  ;;  %v268_v9 = vsub.f32 %v236_v63, %v252_v45  ;;  %411 = vperm.xlu1 %661, %v1086_v19   ;;  %v251_v28 = vmul.f32 %v1091_v31, %v1091_v31  ;;  %v323_v45 = vld [vmem:[%s1402_s1 + $0x20] sm:$0xff] }
  0xce   :  { %v206_v13 = vpop.xlane.xlu1 %205  ;;  %v671_v39 = vpop.eup %670  ;;  %v281_v12 = vmax.f32 %v265_v49, 0.0 }
  0xcf   :  { %678 = vrsqrt.f32 %v298_v8  ;;  %v284_v32 = vmax.f32 %v268_v9, 0.0  ;;  %v238_v56 = vmul.f32 0.0051020407, %v206_v13  ;;  %v202_v57 = vpop.xlane.xlu0 %201  ;;  %v267_v23 = vsub.f32 %v235_v29, %v251_v28  ;;  %v673_v33 = vpop.eup %672 }
  0xd0   :  { %680 = vrsqrt.f32 %v294_v61  ;;  %v237_v63 = vmul.f32 0.0051020407, %v202_v57  ;;  %v1110_v44 = vmul.f32 %v671_v39, %v323_v45  ;;  %v297_v9 = vadd.f32 1e-05, %v281_v12  ;;  %v325_v57 = vld [vmem:[%s1402_s1 + $0x30] sm:$0xff]  ;;  %v332_v12 = vld [vmem:[%s1402_s1 + $0x68] sm:$0xff] }
  0xd1   :  { %v300_v52 = vadd.f32 1e-05, %v284_v32  ;;  %v270_v24 = vsub.f32 %v238_v56, %v254_v36  ;;  %416 = vperm.xlu1 %661, %v1099_v62   ;;  %v324_v36 = vld [vmem:[%s1402_s1 + $0x28] sm:$0xff]  ;;  %v283_v61 = vmax.f32 %v267_v23, 0.0  ;;  %v330_v32 = vld [vmem:[%s1402_s1 + $0x58] sm:$0xff] }
  0xd2   :  { %v269_v49 = vsub.f32 %v237_v63, %v253_v25  ;;  %v340_v13 = vmul.f32 %v673_v33, %v324_v36  ;;  %v326_v63 = vld [vmem:[%s1402_s1 + $0x38] sm:$0xff] }
  0xd3   :  { %682 = vrsqrt.f32 %v300_v52  ;;  %v286_v7 = vmax.f32 %v270_v24, 0.0  ;;  %v299_v45 = vadd.f32 1e-05, %v283_v61 }
  0xd4   :  { %684 = vrsqrt.f32 %v295_v27  ;;  %v285_v27 = vmax.f32 %v269_v49, 0.0  ;;  %v368_v49 = vmul.f32 %v1067_v16, %v1013_v35  ;;  %v354_v35 = vld [vmem:[%s1403_s2 + $0x18] sm:$0xff] }
  0xd5   :  { %v675_v8 = vpop.eup %674  ;;  %v302_v28 = vadd.f32 1e-05, %v286_v7  ;;  %421 = vperm.xlu1 %661, %v1110_v44  }
  0xd6   :  { %v1121_v29 = vmul.f32 %v675_v8, %v328_v37  ;;  %v677_v56 = vpop.eup %676  ;;  %v301_v37 = vadd.f32 1e-05, %v285_v27  ;;  %v334_v8 = vld [vmem:[%s1402_s1 + $0x78] sm:$0xff]  ;;  %v370_v27 = vmul.f32 %v1099_v62, %v1019_v43  ;;  %v356_v43 = vld [vmem:[%s1403_s2 + $0x28] sm:$0xff] }
  0xd7   :  { %686 = vrsqrt.f32 %v302_v28  ;;  %v1130_v24 = vmul.f32 %v677_v56, %v325_v57  ;;  %v327_v28 = vld [vmem:[%s1402_s1 + $0x40] sm:$0xff]  ;;  %v352_v56 = vld [vmem:[%s1403_s2 + $0x8] sm:$0xff] }
  0xd8   :  { %446 = vperm.xlu0 %660, %v1121_v29   ;;  %688 = vrsqrt.f32 %v297_v9 }
  0xd9   :  { %v679_v39 = vpop.eup %678  ;;  %426 = vperm.xlu1 %661, %v340_v13   ;;  %690 = vrsqrt.f32 %v299_v45  ;;  %v384_v45 = vsub.f32 %v352_v56, %v368_v49  ;;  %v351_v49 = vld [vmem:[%s1403_s2] sm:$0xff] }
  0xda   :  { %v346_v52 = vmul.f32 %v679_v39, %v330_v32  ;;  %v681_v23 = vpop.eup %680  ;;  %692 = vrsqrt.f32 %v301_v37  ;;  %v329_v39 = vld [vmem:[%s1402_s1 + $0x50] sm:$0xff] }
  0xdb   :  { %v342_v36 = vmul.f32 %v681_v23, %v326_v63  ;;  %v331_v23 = vld [vmem:[%s1402_s1 + $0x60] sm:$0xff]  ;;  %v386_v63 = vsub.f32 %v354_v35, %v370_v27 }
  0xdc   :  { %456 = vperm.xlu0 %660, %v346_v52  }
  0xdd   :  { %v683_v7 = vpop.eup %682  ;;  %431 = vperm.xlu1 %661, %v1130_v24  }
  0xde   :  { %v348_v33 = vmul.f32 %v683_v7, %v332_v12  ;;  %v685_v25 = vpop.eup %684  ;;  %v372_v7 = vmul.f32 %v340_v13, %v1027_v59  ;;  %v358_v59 = vld [vmem:[%s1403_s2 + $0x38] sm:$0xff]  ;;  %v367_v13 = vmul.f32 %v1071_v54, %v1017_v40  ;;  %v353_v54 = vld [vmem:[%s1403_s2 + $0x10] sm:$0xff] }
  0xdf   :  { %v343_v32 = vmul.f32 %v685_v25, %v327_v28  ;;  %v333_v25 = vld [vmem:[%s1402_s1 + $0x70] sm:$0xff]  ;;  %v374_v28 = vmul.f32 %v342_v36, %v1041_v41  ;;  %v360_v41 = vld [vmem:[%s1403_s2 + $0x48] sm:$0xff] }
  0xe0   :  { %466 = vperm.xlu0 %660, %v348_v33   ;;  %v380_v35 = vmul.f32 %v348_v33, %v1060_v60  ;;  %v366_v60 = vld [vmem:[%s1403_s2 + $0x78] sm:$0xff] }
  0xe1   :  { %v687_v9 = vpop.eup %686  ;;  %436 = vperm.xlu1 %661, %v342_v36   ;;  %v390_v56 = vsub.f32 %v358_v59, %v374_v28  ;;  %v369_v36 = vmul.f32 %v1086_v19, %v1023_v51  ;;  %v355_v51 = vld [vmem:[%s1403_s2 + $0x20] sm:$0xff]  ;;  %v375_v33 = vmul.f32 %v343_v32, %v1047_v53 }
  0xe2   :  { %v350_v61 = vmul.f32 %v687_v9, %v334_v8  ;;  %v689_v57 = vpop.eup %688  ;;  %v388_v8 = vsub.f32 %v356_v43, %v372_v7  ;;  %v363_v53 = vld [vmem:[%s1403_s2 + $0x60] sm:$0xff] }
  0xe3   :  { %v345_v12 = vmul.f32 %v689_v57, %v329_v39  ;;  %v691_v16 = vpop.eup %690  ;;  %v376_v57 = vmul.f32 %v1121_v29, %v1043_v55  ;;  %v383_v39 = vsub.f32 %v351_v49, %v367_v13  ;;  %v385_v27 = vsub.f32 %v353_v54, %v369_v36  ;;  %v362_v55 = vld [vmem:[%s1403_s2 + $0x58] sm:$0xff] }
  0xe4   :  { %476 = vperm.xlu0 %660, %v350_v61   ;;  %v347_v37 = vmul.f32 %v691_v16, %v331_v23  ;;  %v693_v62 = vpop.eup %692  ;;  %v371_v29 = vmul.f32 %v1110_v44, %v1031_v3  ;;  %v357_v3 = vld [vmem:[%s1403_s2 + $0x30] sm:$0xff]  ;;  %v382_v23 = vmul.f32 %v350_v61, %v1083_v48 }
  0xe5   :  { %441 = vperm.xlu1 %661, %v343_v32   ;;  %v349_v9 = vmul.f32 %v693_v62, %v333_v25  ;;  %v392_v40 = vsub.f32 %v360_v41, %v376_v57  ;;  %v377_v43 = vmul.f32 %v345_v12, %v1074_v58  ;;  %v361_v48 = vld [vmem:[%s1403_s2 + $0x50] sm:$0xff] }
  0xe6   :  { %v387_v16 = vsub.f32 %v355_v51, %v371_v29  ;;  %v379_v62 = vmul.f32 %v347_v37, %v1091_v31  ;;  %v365_v58 = vld [vmem:[%s1403_s2 + $0x70] sm:$0xff] }
  0xe7   :  { %v393_v61 = vsub.f32 %v361_v48, %v377_v43  ;;  %v381_v25 = vmul.f32 %v349_v9, %v1104_v17 }
  0xe8   :  { %518 = vperm.xlu0 %660, %v384_v45   ;;  %v378_v45 = vmul.f32 %v346_v52, %v1052_v21  ;;  %v364_v21 = vld [vmem:[%s1403_s2 + $0x68] sm:$0xff]  ;;  %v373_v52 = vmul.f32 %v1130_v24, %v1039_v47  ;;  %v359_v47 = vld [vmem:[%s1403_s2 + $0x40] sm:$0xff]  ;;  %v398_v24 = vsub.f32 %v366_v60, %v382_v23  ;;  %v395_v32 = vsub.f32 %v363_v53, %v379_v62 }
  0xe9   :  { %451 = vperm.xlu1 %661, %v345_v12   ;;  %v396_v44 = vsub.f32 %v364_v21, %v380_v35  ;;  %v391_v7 = vsub.f32 %v359_v47, %v375_v33  ;;  %v397_v12 = vsub.f32 %v365_v58, %v381_v25 }
  0xea   :  { %v394_v19 = vsub.f32 %v362_v55, %v378_v45 }
  0xec   :  { %528 = vperm.xlu0 %660, %v386_v63   ;;  %v389_v63 = vsub.f32 %v357_v3, %v373_v52 }
  0xed   :  { %461 = vperm.xlu1 %661, %v347_v37  }
  0xf0   :  { %538 = vperm.xlu0 %660, %v388_v8  }
  0xf1   :  { %471 = vperm.xlu1 %661, %v349_v9  }
  0xf4   :  { %548 = vperm.xlu0 %660, %v390_v56  }
  0xf5   :  { %513 = vperm.xlu1 %661, %v383_v39  }
  0xf8   :  { %558 = vperm.xlu0 %660, %v392_v40  }
  0xf9   :  { %523 = vperm.xlu1 %661, %v385_v27  }
  0xfc   :  { %568 = vperm.xlu0 %660, %v394_v19  }
  0xfd   :  { %533 = vperm.xlu1 %661, %v387_v16  }
 0x100   :  { %578 = vperm.xlu0 %660, %v396_v44  }
 0x101   :  { %543 = vperm.xlu1 %661, %v389_v63  }
 0x104   :  { %588 = vperm.xlu0 %660, %v398_v24  }
 0x105   :  { %553 = vperm.xlu1 %661, %v391_v7  }
 0x109   :  { %563 = vperm.xlu1 %661, %v393_v61  }
 0x10d   :  { %573 = vperm.xlu1 %661, %v395_v32  }
 0x111   :  { %583 = vperm.xlu1 %661, %v397_v12  }
 0x147   :  { %v407_v8 = vpop.permute.xlu1 %406 }
 0x148   :  { %v402_v13 = vpop.permute.xlu0 %401  ;;  %v481_v36 = vmul.f32 %v407_v8, %v755_v10  ;;  %v482_v54 = vmul.f32 %v407_v8, %v760_v11 }
 0x149   :  { %v480_v23 = vmul.f32 %v402_v13, %v735_v4 }
 0x14c   :  { %v412_v28 = vpop.permute.xlu1 %411 }
 0x14d   :  { %v484_v4 = vmul.f32 %v412_v28, %v723_v1 }
 0x150   :  { %v417_v59 = vpop.permute.xlu1 %416 }
 0x151   :  { %v485_v29 = vmul.f32 %v417_v59, %v740_v5  ;;  %v486_v51 = vmul.f32 %v417_v59, %v745_v6 }
 0x154   :  { %v1225_v31 = vpop.permute.xlu1 %421 }
 0x155   :  { %v487_v1 = vmul.f32 %v1225_v31, %v787_v20  ;;  %v488_v32 = vmul.f32 %v1225_v31, %v773_v15 }
 0x157   :  { %v447_v37 = vpop.permute.xlu0 %446 }
 0x158   :  { %v427_v49 = vpop.permute.xlu1 %426  ;;  %v498_v7 = vmul.f32 %v447_v37, %v820_v30 }
 0x159   :  { %v489_v16 = vmul.f32 %v427_v49, %v780_v18  ;;  %v490_v5 = vmul.f32 %v427_v49, %v768_v14  ;;  %v479_v14 = vmul.f32 %v402_v13, %v728_v2  ;;  %v483_v2 = vmul.f32 %v412_v28, %v718_v0  ;;  %v1429_v28 = vld [vmem:[#allocation3_spill] sm:$0xff]  ;;  %v1430_v13 = vld [vmem:[#allocation2_spill] sm:$0xff] }
 0x15b   :  { %v457_v56 = vpop.permute.xlu0 %456 }
 0x15c   :  { %v1227_v57 = vpop.permute.xlu1 %431  ;;  %v501_v53 = vmul.f32 %v457_v56, %v858_v42  ;;  %v502_v0 = vmul.f32 %v457_v56, %v846_v38 }
 0x15d   :  { %v491_v59 = vmul.f32 %v1227_v57, %v1429_v28  ;;  %v492_v31 = vmul.f32 %v1227_v57, %v1430_v13 }
 0x15f   :  { %v1229_v39 = vpop.permute.xlu0 %466 }
 0x160   :  { %v437_v17 = vpop.permute.xlu1 %436  ;;  %v505_v20 = vmul.f32 %v1229_v39, %v884_v50  ;;  %v506_v15 = vmul.f32 %v1229_v39, %v872_v46 }
 0x161   :  { %v493_v44 = vmul.f32 %v437_v17, %v806_v26  ;;  %v494_v18 = vmul.f32 %v437_v17, %v794_v22  ;;  %v497_v22 = vmul.f32 %v447_v37, %v832_v34  ;;  %v1431_v17 = vld [vmem:[#allocation12_spill] sm:$0xff] }
 0x163   :  { %v1231_v9 = vpop.permute.xlu0 %476 }
 0x164   :  { %v1233_v41 = vpop.permute.xlu1 %441 }
 0x167   :  { %v519_v40 = vpop.permute.xlu0 %518 }
 0x168   :  { %v1237_v45 = vpop.permute.xlu1 %451  ;;  %v593_v27 = vadd.f32 %v519_v40, %v481_v36  ;;  %v594_v55 = vadd.f32 %v519_v40, %v482_v54  ;;  %v509_v36 = vmul.f32 %v1231_v9, %v1431_v17  ;;  %v1432_v54 = vld [vmem:[#allocation10_spill] sm:$0xff]  ;;  %v1433_v40 = vld [vmem:[#allocation5_spill] sm:$0xff] }
 0x169   :  { %v510_v57 = vmul.f32 %v1231_v9, %v1432_v54 }
 0x16a   :  { %625 = vst [vmem:[%s1404_s3 + $0x10] sm:$0xff] %v593_v27  ;;  %626 = vst.msk [vmem:[%s1404_s3 + $0x18] sm:$0xff] %vm46_vm0, %v594_v55  ;;  %v495_v27 = vmul.f32 %v1233_v41, %v1433_v40  ;;  %v1434_v55 = vld [vmem:[#allocation4_spill] sm:$0xff] }
 0x16b   :  { %v529_v10 = vpop.permute.xlu0 %528 }
 0x16c   :  { %v1248_v11 = vpop.permute.xlu1 %461  ;;  %v597_v19 = vadd.f32 %v529_v10, %v485_v29  ;;  %v598_v35 = vadd.f32 %v529_v10, %v486_v51  ;;  %v496_v29 = vmul.f32 %v1233_v41, %v1434_v55  ;;  %v1435_v41 = vld [vmem:[#allocation7_spill] sm:$0xff] }
 0x16e   :  { %629 = vst [vmem:[%s1404_s3 + $0x30] sm:$0xff] %v597_v19  ;;  %630 = vst.msk [vmem:[%s1404_s3 + $0x38] sm:$0xff] %vm46_vm0, %v598_v35 }
 0x16f   :  { %v539_v6 = vpop.permute.xlu0 %538 }
 0x170   :  { %v1259_v21 = vpop.permute.xlu1 %471  ;;  %v601_v52 = vadd.f32 %v539_v6, %v489_v16  ;;  %v602_v3 = vadd.f32 %v539_v6, %v490_v5  ;;  %v499_v5 = vmul.f32 %v1237_v45, %v1435_v41  ;;  %v1436_v6 = vld [vmem:[#allocation6_spill] sm:$0xff] }
 0x172   :  { %633 = vst [vmem:[%s1404_s3 + $0x50] sm:$0xff] %v601_v52  ;;  %634 = vst.msk [vmem:[%s1404_s3 + $0x58] sm:$0xff] %vm46_vm0, %v602_v3  ;;  %v500_v52 = vmul.f32 %v1237_v45, %v1436_v6 }
 0x173   :  { %v549_v63 = vpop.permute.xlu0 %548 }
 0x174   :  { %v514_v60 = vpop.permute.xlu1 %513  ;;  %v605_v33 = vadd.f32 %v549_v63, %v493_v44  ;;  %v606_v47 = vadd.f32 %v549_v63, %v494_v18  ;;  %v1438_v63 = vld [vmem:[#allocation8_spill] sm:$0xff] }
 0x175   :  { %v591_v26 = vadd.f32 %v514_v60, %v479_v14  ;;  %v592_v24 = vadd.f32 %v514_v60, %v480_v23  ;;  %v1437_v14 = vld [vmem:[#allocation9_spill] sm:$0xff]  ;;  %v504_v60 = vmul.f32 %v1248_v11, %v1438_v63 }
 0x176   :  { %637 = vst [vmem:[%s1404_s3 + $0x70] sm:$0xff] %v605_v33  ;;  %638 = vst.msk [vmem:[%s1404_s3 + $0x78] sm:$0xff] %vm46_vm0, %v606_v47  ;;  %v503_v23 = vmul.f32 %v1248_v11, %v1437_v14 }
 0x177   :  { %623 = vst [vmem:[%s1404_s3] sm:$0xff] %v591_v26  ;;  %624 = vst.msk [vmem:[%s1404_s3 + $0x8] sm:$0xff] %vm46_vm0, %v592_v24  ;;  %v559_v30 = vpop.permute.xlu0 %558  ;;  %v1439_v26 = vld [vmem:[#allocation13_spill] sm:$0xff] }
 0x178   :  { %v524_v34 = vpop.permute.xlu1 %523  ;;  %v609_v43 = vadd.f32 %v559_v30, %v497_v22  ;;  %v610_v48 = vadd.f32 %v559_v30, %v498_v7  ;;  %v507_v24 = vmul.f32 %v1259_v21, %v1439_v26  ;;  %v1440_v22 = vld [vmem:[#allocation11_spill] sm:$0xff] }
 0x179   :  { %v595_v61 = vadd.f32 %v524_v34, %v483_v2  ;;  %v596_v62 = vadd.f32 %v524_v34, %v484_v4  ;;  %v508_v7 = vmul.f32 %v1259_v21, %v1440_v22 }
 0x17a   :  { %641 = vst [vmem:[%s1404_s3 + $0x90] sm:$0xff] %v609_v43  ;;  %642 = vst.msk [vmem:[%s1404_s3 + $0x98] sm:$0xff] %vm46_vm0, %v610_v48 }
 0x17b   :  { %627 = vst [vmem:[%s1404_s3 + $0x20] sm:$0xff] %v595_v61  ;;  %628 = vst.msk [vmem:[%s1404_s3 + $0x28] sm:$0xff] %vm46_vm0, %v596_v62  ;;  %v569_v38 = vpop.permute.xlu0 %568 }
 0x17c   :  { %v534_v42 = vpop.permute.xlu1 %533  ;;  %v613_v25 = vadd.f32 %v569_v38, %v501_v53  ;;  %v614_v58 = vadd.f32 %v569_v38, %v502_v0 }
 0x17d   :  { %v599_v12 = vadd.f32 %v534_v42, %v487_v1  ;;  %v600_v8 = vadd.f32 %v534_v42, %v488_v32 }
 0x17e   :  { %645 = vst [vmem:[%s1404_s3 + $0xb0] sm:$0xff] %v613_v25  ;;  %646 = vst.msk [vmem:[%s1404_s3 + $0xb8] sm:$0xff] %vm46_vm0, %v614_v58 }
 0x17f   :  { %631 = vst [vmem:[%s1404_s3 + $0x40] sm:$0xff] %v599_v12  ;;  %632 = vst.msk [vmem:[%s1404_s3 + $0x48] sm:$0xff] %vm46_vm0, %v600_v8  ;;  %v579_v46 = vpop.permute.xlu0 %578 }
 0x180   :  { %v544_v50 = vpop.permute.xlu1 %543  ;;  %v617_v37 = vadd.f32 %v579_v46, %v505_v20  ;;  %v618_v49 = vadd.f32 %v579_v46, %v506_v15 }
 0x181   :  { %v603_v56 = vadd.f32 %v544_v50, %v491_v59  ;;  %v604_v39 = vadd.f32 %v544_v50, %v492_v31 }
 0x182   :  { %649 = vst [vmem:[%s1404_s3 + $0xd0] sm:$0xff] %v617_v37  ;;  %650 = vst.msk [vmem:[%s1404_s3 + $0xd8] sm:$0xff] %vm46_vm0, %v618_v49 }
 0x183   :  { %635 = vst [vmem:[%s1404_s3 + $0x60] sm:$0xff] %v603_v56  ;;  %636 = vst.msk [vmem:[%s1404_s3 + $0x68] sm:$0xff] %vm46_vm0, %v604_v39  ;;  %v589_v9 = vpop.permute.xlu0 %588 }
 0x184   :  { %v554_v51 = vpop.permute.xlu1 %553  ;;  %v621_v10 = vadd.f32 %v589_v9, %v509_v36  ;;  %v622_v19 = vadd.f32 %v589_v9, %v510_v57 }
 0x185   :  { %v607_v35 = vadd.f32 %v554_v51, %v495_v27  ;;  %v608_v16 = vadd.f32 %v554_v51, %v496_v29 }
 0x186   :  { %653 = vst [vmem:[%s1404_s3 + $0xf0] sm:$0xff] %v621_v10  ;;  %654 = vst.msk [vmem:[%s1404_s3 + $0xf8] sm:$0xff] %vm46_vm0, %v622_v19 }
 0x187   :  { %639 = vst [vmem:[%s1404_s3 + $0x80] sm:$0xff] %v607_v35  ;;  %640 = vst.msk [vmem:[%s1404_s3 + $0x88] sm:$0xff] %vm46_vm0, %v608_v16 }
 0x188   :  { %v564_v3 = vpop.permute.xlu1 %563 }
 0x189   :  { %v611_v44 = vadd.f32 %v564_v3, %v499_v5  ;;  %v612_v18 = vadd.f32 %v564_v3, %v500_v52 }
 0x18b   :  { %643 = vst [vmem:[%s1404_s3 + $0xa0] sm:$0xff] %v611_v44  ;;  %644 = vst.msk [vmem:[%s1404_s3 + $0xa8] sm:$0xff] %vm46_vm0, %v612_v18 }
 0x18c   :  { %v574_v45 = vpop.permute.xlu1 %573 }
 0x18d   :  { %v615_v33 = vadd.f32 %v574_v45, %v503_v23  ;;  %v616_v47 = vadd.f32 %v574_v45, %v504_v60 }
 0x18f   :  { %647 = vst [vmem:[%s1404_s3 + $0xc0] sm:$0xff] %v615_v33  ;;  %648 = vst.msk [vmem:[%s1404_s3 + $0xc8] sm:$0xff] %vm46_vm0, %v616_v47 }
 0x190   :  { %v584_v11 = vpop.permute.xlu1 %583 }
 0x191   :  { %v619_v2 = vadd.f32 %v584_v11, %v507_v24  ;;  %v620_v4 = vadd.f32 %v584_v11, %v508_v7 }
 0x193   :  { %651 = vst [vmem:[%s1404_s3 + $0xe0] sm:$0xff] %v619_v2  ;;  %652 = vst.msk [vmem:[%s1404_s3 + $0xe8] sm:$0xff] %vm46_vm0, %v620_v4 }

</bundles_post_ra>
